<compile_context>
chip_gen: v7x
topology: tpu7x:2x2x1
jax: 0.10.0
libtpu: 0.0.40
codegen_flags: <defaults>
</compile_context>

<pallas_src>
import functools
import math

import jax
import jax.numpy as jnp
from jax.experimental import pallas as pl
from jax.experimental.pallas import tpu as pltpu


def _quantizer_kernel(x_ref, g_ref, emb_t_ref,
                      sampled_ref, logqy_ref, kl_ref,
                      oh_ref, *, tau, num_embeddings):
    B, N, S = x_ref.shape
    inv_tau = jnp.float32(1.0 / tau)
    log_uniform = jnp.float32(math.log(1.0 / num_embeddings))

    x = x_ref[...]                               # (B, N, S) logits, lanes = S
    g = g_ref[...]                               # (B, N, S) Gumbel(0,1) noise
    emb_t = emb_t_ref[...]                       # (D, N)

    # ---- gumbel_softmax((x + g) / tau) over N (sublane axis), batched over B
    gl = (x + g) * inv_tau
    gl = gl - jnp.max(gl, axis=1, keepdims=True)
    e = jnp.exp(gl)
    inv_sum_e = 1.0 / jnp.sum(e, axis=1, keepdims=True)           # (B, 1, S) exact
    one_hot = e * inv_sum_e                                       # (B, N, S)

    # ---- single fused MXU call: (D, N) @ (N, B*S) --------------------------
    # Stage one_hot lane-contiguously (offsets are static multiples of 128).
    for b in range(B):                                            # B small & static
        oh_ref[:, b * S:(b + 1) * S] = one_hot[b]
    sampled_cat = jnp.dot(emb_t, oh_ref[...],
                          preferred_element_type=jnp.float32)     # (D, B*S)
    for b in range(B):
        sampled_ref[b] = sampled_cat[:, b * S:(b + 1) * S]        # (D, S) halves

    # ---- log_softmax over N, batched over B ---------------------------------
    sh = x - jnp.max(x, axis=1, keepdims=True)
    ex = jnp.exp(sh)
    se = jnp.sum(ex, axis=1, keepdims=True)                       # (B, 1, S)
    log_se = jnp.log(se)
    logqy_ref[...] = sh - log_se                                  # (B, N, S)

    # ---- KL(q || uniform): per column  sum_n q*log_qy = sum_n(ex*sh)/se - log(se)
    col = jnp.sum(ex * sh, axis=1, keepdims=True) / se - log_se   # (B, 1, S)
    # Each softmax row sums to exactly 1, so sum q*log_uniform == B*S*log_uniform.
    # Note: 'batchmean' divisor is log_uniform.size(0) == 1 in the reference.
    kl_ref[0] = jnp.sum(col) - jnp.float32(B * S) * log_uniform


@functools.partial(jax.jit, static_argnames=("tau",))
def quantizer_forward(x_nchw, emb_weight, noise_key, tau=0.9):
    """x_nchw: (B, N, H, W) f32; emb_weight: (N, D) f32; noise_key: PRNG key."""
    B, N, H, W = x_nchw.shape
    Nw, D = emb_weight.shape
    assert Nw == N, "channel dim must equal num_embeddings"
    S = H * W

    x_bns = x_nchw.reshape(B, N, S)            # NCHW -> (B, N, S): pure reshape
    emb_t = jnp.transpose(emb_weight)          # (D, N): tiny one-time transpose
    # Gumbel noise generated host-side of the kernel (portable; the RNG stream
    # necessarily differs from torch's).
    gumbel = jax.random.gumbel(noise_key, (B, N, S), dtype=jnp.float32)

    kernel = functools.partial(_quantizer_kernel, tau=tau, num_embeddings=N)

    sampled_bds, logqy_bns, kl = pl.pallas_call(
        kernel,
        out_shape=(
            jax.ShapeDtypeStruct((B, D, S), jnp.float32),   # sampled (B, D, S)
            jax.ShapeDtypeStruct((B, N, S), jnp.float32),   # log_qy  (B, N, S)
            jax.ShapeDtypeStruct((1,), jnp.float32),        # kl scalar
        ),
        in_specs=[
            pl.BlockSpec((B, N, S), lambda: (0, 0, 0)),     # logits
            pl.BlockSpec((B, N, S), lambda: (0, 0, 0)),     # gumbel noise
            pl.BlockSpec((D, N), lambda: (0, 0)),           # emb.T
        ],
        out_specs=(
            pl.BlockSpec((B, D, S), lambda: (0, 0, 0)),     # sampled
            pl.BlockSpec((B, N, S), lambda: (0, 0, 0)),     # log_qy
            pl.BlockSpec(memory_space=pltpu.MemorySpace.SMEM),   # kl
        ),
        scratch_shapes=[pltpu.VMEM((N, B * S), jnp.float32)],    # one_hot staging
    )(x_bns, gumbel, emb_t)

    sampled = sampled_bds.reshape(B, D, H, W)         # (B,D,S) -> NCHW, reshape only
    logits = jnp.transpose(x_bns, (0, 2, 1))          # 'b n h w -> b (h w) n'
    log_qy = jnp.transpose(logqy_bns, (0, 2, 1))      # (B, S, N); fuses under this jit
    return sampled, kl[0], logits, log_qy


if __name__ == "__main__":
    key = jax.random.PRNGKey(0)
    k_x, k_emb, k_noise = jax.random.split(key, 3)

    # Small shapes consistent with the module: B=2, num_embeddings(N)=8,
    # H=W=16, embedding_dim(D)=32.
    B, N, H, W, D = 2, 8, 16, 16, 32
    S = H * W
    tau = 0.9

    x = jax.random.normal(k_x, (B, N, H, W), dtype=jnp.float32)
    # nn.Embedding default init is N(0, 1).
    emb_weight = jax.random.normal(k_emb, (N, D), dtype=jnp.float32)

    sampled, kl_div, logits, log_qy = quantizer_forward(x, emb_weight, k_noise)
    jax.block_until_ready((sampled, kl_div, logits, log_qy))

    assert sampled.shape == (B, D, H, W)
    assert logits.shape == (B, S, N)
    assert log_qy.shape == (B, S, N)
    assert kl_div.shape == ()

    # Plain-JAX reference (same gumbel noise, so ALL outputs are checkable).
    x_bns = x.reshape(B, N, S)
    g = jax.random.gumbel(k_noise, (B, N, S), dtype=jnp.float32)
    ref_one_hot = jax.nn.softmax((x_bns + g) / tau, axis=1)            # (B, N, S)
    ref_sampled = jnp.einsum('bns,nd->bds', ref_one_hot,
                             emb_weight).reshape(B, D, H, W)
    ref_logits = jnp.transpose(x_bns, (0, 2, 1))
    ref_log_qy = jax.nn.log_softmax(ref_logits, axis=-1)
    ref_kl = jnp.sum(jnp.exp(ref_log_qy) * (ref_log_qy - math.log(1.0 / N)))

    assert bool(jnp.allclose(logits, ref_logits))
    assert bool(jnp.allclose(log_qy, ref_log_qy, atol=1e-3, rtol=1e-3))
    assert bool(jnp.allclose(sampled, ref_sampled, atol=2e-3, rtol=1e-3))
    assert bool(jnp.allclose(kl_div, ref_kl, rtol=2e-3, atol=1e-1))
    assert bool(jnp.all(jnp.isfinite(sampled)))

    print("KERNEL_OK")
</pallas_src>

<mosaic_0001>
module attributes {stable_mosaic.version = 11 : i64} {
  func.func @_quantizer_kernel(%arg0: memref<2x8x256xf32, #tpu.memory_space<vmem>>, %arg1: memref<2x8x256xf32, #tpu.memory_space<vmem>>, %arg2: memref<32x8xf32, #tpu.memory_space<vmem>>, %arg3: memref<2x32x256xf32, #tpu.memory_space<vmem>>, %arg4: memref<2x8x256xf32, #tpu.memory_space<vmem>>, %arg5: memref<1xf32, #tpu.memory_space<smem>>, %arg6: memref<8x512xf32, #tpu.memory_space<vmem>>) attributes {dimension_semantics = [], scalar_prefetch = 0 : i64, scratch_operands = 1 : i64, tpu.core_type = #tpu.core_type<tc>} {
    %c0 = arith.constant 0 : index
    %c0_0 = arith.constant 0 : index
    %c0_1 = arith.constant 0 : index
    %0 = vector.load %arg0[%c0, %c0_0, %c0_1] : memref<2x8x256xf32, #tpu.memory_space<vmem>>, vector<2x8x256xf32>
    %c0_2 = arith.constant 0 : index
    %c0_3 = arith.constant 0 : index
    %c0_4 = arith.constant 0 : index
    %1 = vector.load %arg1[%c0_2, %c0_3, %c0_4] : memref<2x8x256xf32, #tpu.memory_space<vmem>>, vector<2x8x256xf32>
    %c0_5 = arith.constant 0 : index
    %c0_6 = arith.constant 0 : index
    %2 = vector.load %arg2[%c0_5, %c0_6] : memref<32x8xf32, #tpu.memory_space<vmem>>, vector<32x8xf32>
    %3 = arith.addf %0, %1 : vector<2x8x256xf32>
    %cst = arith.constant 1.11111116 : f32
    %4 = vector.broadcast %cst : f32 to vector<2x8x256xf32>
    %5 = arith.mulf %3, %4 : vector<2x8x256xf32>
    %cst_7 = arith.constant dense<0xFF800000> : vector<2x256xf32>
    %6 = vector.multi_reduction <maximumf>, %5, %cst_7 [1] : vector<2x8x256xf32> to vector<2x256xf32>
    %7 = vector.shape_cast %6 : vector<2x256xf32> to vector<2x1x256xf32>
    %8 = vector.broadcast %7 : vector<2x1x256xf32> to vector<2x8x256xf32>
    %9 = arith.subf %5, %8 : vector<2x8x256xf32>
    %10 = math.exp %9 : vector<2x8x256xf32>
    %cst_8 = arith.constant dense<0.000000e+00> : vector<2x256xf32>
    %11 = vector.multi_reduction <add>, %10, %cst_8 [1] : vector<2x8x256xf32> to vector<2x256xf32>
    %12 = vector.shape_cast %11 : vector<2x256xf32> to vector<2x1x256xf32>
    %cst_9 = arith.constant 1.000000e+00 : f32
    %13 = vector.broadcast %cst_9 : f32 to vector<2x1x256xf32>
    %14 = arith.divf %13, %12 : vector<2x1x256xf32>
    %15 = vector.broadcast %14 : vector<2x1x256xf32> to vector<2x8x256xf32>
    %16 = arith.mulf %10, %15 : vector<2x8x256xf32>
    %17 = vector.extract_strided_slice %16 {offsets = [0, 0, 0], sizes = [1, 8, 256], strides = [1, 1, 1]} : vector<2x8x256xf32> to vector<1x8x256xf32>
    %18 = vector.shape_cast %17 : vector<1x8x256xf32> to vector<8x256xf32>
    %c0_10 = arith.constant 0 : index
    %c0_11 = arith.constant 0 : index
    %19 = vector.load %arg6[%c0_10, %c0_11] : memref<8x512xf32, #tpu.memory_space<vmem>>, vector<8x256xf32>
    tpu.vector_store %arg6[%c0_10, %c0_11], %18 {strides = array<i32>} : memref<8x512xf32, #tpu.memory_space<vmem>>, vector<8x256xf32>,
    %20 = vector.extract_strided_slice %16 {offsets = [1, 0, 0], sizes = [1, 8, 256], strides = [1, 1, 1]} : vector<2x8x256xf32> to vector<1x8x256xf32>
    %21 = vector.shape_cast %20 : vector<1x8x256xf32> to vector<8x256xf32>
    %c0_12 = arith.constant 0 : index
    %c256 = arith.constant 256 : index
    %22 = vector.load %arg6[%c0_12, %c256] : memref<8x512xf32, #tpu.memory_space<vmem>>, vector<8x256xf32>
    tpu.vector_store %arg6[%c0_12, %c256], %21 {strides = array<i32>} : memref<8x512xf32, #tpu.memory_space<vmem>>, vector<8x256xf32>,
    %c0_13 = arith.constant 0 : index
    %c0_14 = arith.constant 0 : index
    %23 = vector.load %arg6[%c0_13, %c0_14] : memref<8x512xf32, #tpu.memory_space<vmem>>, vector<8x512xf32>
    %cst_15 = arith.constant dense<0.000000e+00> : vector<32x512xf32>
    %24 = tpu.matmul %2, %23, %cst_15 {dimension_numbers = #tpu.dot_dimension_numbers<[1], [0], [0], [1], [0, 0, 1, 1], [], []>} : vector<32x8xf32>, vector<8x512xf32>, vector<32x512xf32> -> vector<32x512xf32>
    %25 = vector.extract_strided_slice %24 {offsets = [0, 0], sizes = [32, 256], strides = [1, 1]} : vector<32x512xf32> to vector<32x256xf32>
    %c0_16 = arith.constant 0 : index
    %c0_17 = arith.constant 0 : index
    %c0_18 = arith.constant 0 : index
    %26 = vector.load %arg3[%c0_16, %c0_17, %c0_18] : memref<2x32x256xf32, #tpu.memory_space<vmem>>, vector<1x32x256xf32>
    %27 = vector.shape_cast %26 : vector<1x32x256xf32> to vector<32x256xf32>
    %28 = vector.shape_cast %25 : vector<32x256xf32> to vector<1x32x256xf32>
    tpu.vector_store %arg3[%c0_16, %c0_17, %c0_18], %28 {strides = array<i32>} : memref<2x32x256xf32, #tpu.memory_space<vmem>>, vector<1x32x256xf32>,
    %29 = vector.extract_strided_slice %24 {offsets = [0, 256], sizes = [32, 256], strides = [1, 1]} : vector<32x512xf32> to vector<32x256xf32>
    %c1 = arith.constant 1 : index
    %c0_19 = arith.constant 0 : index
    %c0_20 = arith.constant 0 : index
    %30 = vector.load %arg3[%c1, %c0_19, %c0_20] : memref<2x32x256xf32, #tpu.memory_space<vmem>>, vector<1x32x256xf32>
    %31 = vector.shape_cast %30 : vector<1x32x256xf32> to vector<32x256xf32>
    %32 = vector.shape_cast %29 : vector<32x256xf32> to vector<1x32x256xf32>
    tpu.vector_store %arg3[%c1, %c0_19, %c0_20], %32 {strides = array<i32>} : memref<2x32x256xf32, #tpu.memory_space<vmem>>, vector<1x32x256xf32>,
    %cst_21 = arith.constant dense<0xFF800000> : vector<2x256xf32>
    %33 = vector.multi_reduction <maximumf>, %0, %cst_21 [1] : vector<2x8x256xf32> to vector<2x256xf32>
    %34 = vector.shape_cast %33 : vector<2x256xf32> to vector<2x1x256xf32>
    %35 = vector.broadcast %34 : vector<2x1x256xf32> to vector<2x8x256xf32>
    %36 = arith.subf %0, %35 : vector<2x8x256xf32>
    %37 = math.exp %36 : vector<2x8x256xf32>
    %cst_22 = arith.constant dense<0.000000e+00> : vector<2x256xf32>
    %38 = vector.multi_reduction <add>, %37, %cst_22 [1] : vector<2x8x256xf32> to vector<2x256xf32>
    %39 = vector.shape_cast %38 : vector<2x256xf32> to vector<2x1x256xf32>
    %40 = math.log %39 : vector<2x1x256xf32>
    %41 = vector.broadcast %40 : vector<2x1x256xf32> to vector<2x8x256xf32>
    %42 = arith.subf %36, %41 : vector<2x8x256xf32>
    %c0_23 = arith.constant 0 : index
    %c0_24 = arith.constant 0 : index
    %c0_25 = arith.constant 0 : index
    %43 = vector.load %arg4[%c0_23, %c0_24, %c0_25] : memref<2x8x256xf32, #tpu.memory_space<vmem>>, vector<2x8x256xf32>
    tpu.vector_store %arg4[%c0_23, %c0_24, %c0_25], %42 {strides = array<i32>} : memref<2x8x256xf32, #tpu.memory_space<vmem>>, vector<2x8x256xf32>,
    %44 = arith.mulf %37, %36 : vector<2x8x256xf32>
    %cst_26 = arith.constant dense<0.000000e+00> : vector<2x256xf32>
    %45 = vector.multi_reduction <add>, %44, %cst_26 [1] : vector<2x8x256xf32> to vector<2x256xf32>
    %46 = vector.shape_cast %45 : vector<2x256xf32> to vector<2x1x256xf32>
    %47 = arith.divf %46, %39 : vector<2x1x256xf32>
    %48 = arith.subf %47, %40 : vector<2x1x256xf32>
    %49 = vector.shape_cast %48 : vector<2x1x256xf32> to vector<1x2x1x256xf32>
    %cst_27 = arith.constant dense<0.000000e+00> : vector<1xf32>
    %50 = vector.multi_reduction <add>, %49, %cst_27 [1, 2, 3] : vector<1x2x1x256xf32> to vector<1xf32>
    %51 = vector.shape_cast %50 : vector<1xf32> to vector<1x1x1x1xf32>
    %52 = vector.extract %51[0, 0, 0, 0] : f32 from vector<1x1x1x1xf32>
    %cst_28 = arith.constant 5.120000e+02 : f32
    %cst_29 = arith.constant -2.07944155 : f32
    %53 = arith.mulf %cst_28, %cst_29 : f32
    %54 = arith.subf %52, %53 : f32
    %c0_30 = arith.constant 0 : index
    %55 = memref.load %arg5[%c0_30] : memref<1xf32, #tpu.memory_space<smem>>
    memref.store %54, %arg5[%c0_30] : memref<1xf32, #tpu.memory_space<smem>>
    return
  }
}

</mosaic_0001>

<bundles_post_ra>
// kernel: quantizer_forward.1
= control target key start
LH: loop header
LB: loop body
LE: loop exit
PB: predicated region body
PF: predicated region fallthrough
CT: control target
= control target key end

     0   :  { %11 = vsyncpa [#allocation4], 0  ;;  %v596_v7 = vmov 0.0   ;;  %s828_s0 = inlined_call_operand.vmem [shape: f32[2,8,256], index: 0, kind: input, shape index: {}]   ;;  %s829_s1 = inlined_call_operand.vmem [shape: f32[2,8,256], index: 1, kind: input, shape index: {}]   ;;  %s830_s2 = inlined_call_operand.vmem [shape: f32[32,8], index: 2, kind: input, shape index: {}]   ;;  %s831_s3 = inlined_call_operand.vmem [shape: f32[2,32,256], index: 3, kind: output, shape index: {0}]   ;;  %s832_s4 = inlined_call_operand.hbm [shape: f32[2,8,256], index: 4, kind: output, shape index: {1}]   ;;  %s833_s5 = inlined_call_operand.hbm [shape: f32[1], index: 5, kind: output, shape index: {2}]  }
   0x1   :  { %v20_v0 = vld [vmem:[%s828_s0 + $0x8] sm:$0xff]  ;;  %v640_v2 = vld [vmem:[%s828_s0 + $0x18] sm:$0xff]  ;;  %v19_v5 = vld [vmem:[%s828_s0] sm:$0xff]  ;;  %196 = vmatprep.mubr.f32.mxu0 %v596_v7  ;;  %285 = vmatprep.mubr.f32.mxu1 %v596_v7 }
   0x2   :  { %v24_v1 = vld [vmem:[%s829_s1 + $0x8] sm:$0xff]  ;;  %v26_v4 = vld [vmem:[%s829_s1 + $0x18] sm:$0xff]  ;;  %v23_v6 = vld [vmem:[%s829_s1] sm:$0xff]  ;;  %v333_v8 = vrot.slane %v20_v0, 4  ;;  %v345_v9 = vrot.slane %v640_v2, 4  ;;  %v327_v14 = vrot.slane %v19_v5, 4 }
   0x3   :  { %v32_v3 = vadd.f32 %v24_v1, %v20_v0  ;;  %v34_v10 = vadd.f32 %v26_v4, %v640_v2  ;;  %v31_v11 = vadd.f32 %v23_v6, %v19_v5  ;;  %v21_v12 = vld [vmem:[%s828_s0 + $0x10] sm:$0xff] }
   0x4   :  { %v25_v13 = vld [vmem:[%s829_s1 + $0x10] sm:$0xff]  ;;  %v334_v17 = vmax.f32 %v20_v0, %v333_v8  ;;  %v339_v18 = vrot.slane %v21_v12, 4  ;;  %v328_v21 = vmax.f32 %v19_v5, %v327_v14  ;;  %v346_v22 = vmax.f32 %v640_v2, %v345_v9 }
   0x5   :  { %v661_v15 = vmul.f32 1.1111112, %v32_v3  ;;  %v33_v16 = vadd.f32 %v25_v13, %v21_v12  ;;  %v663_v19 = vmul.f32 1.1111112, %v34_v10  ;;  %v665_v20 = vmul.f32 1.1111112, %v31_v11 }
   0x6   :  { %12 = vsyncpa [#allocation5], 0  ;;  %v335_v25 = vrot.slane %v334_v17, 2  ;;  %v340_v26 = vmax.f32 %v21_v12, %v339_v18  ;;  %v329_v29 = vrot.slane %v328_v21, 2  ;;  %v347_v30 = vrot.slane %v346_v22, 2  ;;  %s597_s15 = smov [#allocation3]  }
   0x7   :  { %v45_v23 = vrot.slane %v661_v15, 4  ;;  %v37_v24 = vmul.f32 1.1111112, %v33_v16  ;;  %v57_v27 = vrot.slane %v663_v19, 4  ;;  %v39_v28 = vrot.slane %v665_v20, 4  ;;  %s470_s16 = sshll.u32 %s597_s15, 4  ;;  %s471_s16 = int_to_ptr.vmem [resolvable:$true] %s470_s16 }
   0x8   :  { %v336_v33 = vmax.f32 %v334_v17, %v335_v25  ;;  %v341_v34 = vrot.slane %v340_v26, 2  ;;  %v330_v37 = vmax.f32 %v328_v21, %v329_v29  ;;  %v348_v38 = vmax.f32 %v346_v22, %v347_v30  ;;  %s560_s17 = scalar_lea.vmem %s471_s16, 512  ;;  %p565_p1 = scmp.lt.s32.totalorder %s471_s16, %s471_s16 }
   0x9   :  { %v46_v31 = vmax.f32 %v661_v15, %v45_v23  ;;  %v51_v32 = vrot.slane %v37_v24, 4  ;;  %v58_v35 = vmax.f32 %v663_v19, %v57_v27  ;;  %v40_v36 = vmax.f32 %v665_v20, %v39_v28  ;;  %p561_p0 = scmp.ne.s32.totalorder %s471_s16, %s560_s17  ;;  %p566_p2 = scmp.lt.s32.totalorder %s560_s17, %s560_s17 }
   0xa   :  { %v337_v41 = vrot.slane %v336_v33, 1  ;;  %v342_v42 = vmax.f32 %v340_v26, %v341_v34  ;;  %v331_v45 = vrot.slane %v330_v37, 1  ;;  %v349_v46 = vrot.slane %v348_v38, 1 }
   0xb   :  { %v47_v39 = vrot.slane %v46_v31, 2  ;;  %v52_v40 = vmax.f32 %v37_v24, %v51_v32  ;;  %v59_v43 = vrot.slane %v58_v35, 2  ;;  %v41_v44 = vrot.slane %v40_v36, 2  ;;  %p567_p3 = por %p566_p2, %p565_p1 }
   0xc   :  { %v338_v49 = vmax.f32 %v336_v33, %v337_v41  ;;  %v343_v50 = vrot.slane %v342_v42, 1  ;;  %v332_v53 = vmax.f32 %v330_v37, %v331_v45  ;;  %v350_v54 = vmax.f32 %v348_v38, %v349_v46 }
   0xd   :  { %v48_v47 = vmax.f32 %v46_v31, %v47_v39  ;;  %v53_v48 = vrot.slane %v52_v40, 2  ;;  %v60_v51 = vmax.f32 %v58_v35, %v59_v43  ;;  %v42_v52 = vmax.f32 %v40_v36, %v41_v44  ;;  %p568_p4 = pnand %p567_p3, %p561_p0 }
   0xe   :  { %v344_v57 = vmax.f32 %v342_v42, %v343_v50  ;;  %v674_v58 = vsub.f32 %v20_v0, %v338_v49  ;;  %v676_v61 = vsub.f32 %v19_v5, %v332_v53  ;;  %v679_v62 = vsub.f32 %v640_v2, %v350_v54 }
   0xf   :  { %v49_v55 = vrot.slane %v48_v47, 1  ;;  %v54_v56 = vmax.f32 %v52_v40, %v53_v48  ;;  %v61_v59 = vrot.slane %v60_v51, 1  ;;  %v43_v60 = vrot.slane %v42_v52, 1 }
  0x10   :  { %v681_v3 = vsub.f32 %v21_v12, %v344_v57  ;;  %v357_v4 = vmul.f32 1.442695, %v674_v58  ;;  %v355_v9 = vmul.f32 1.442695, %v676_v61  ;;  %v361_v0 = vmul.f32 1.442695, %v679_v62 }
  0x11   :  { %v50_v63 = vmax.f32 %v48_v47, %v49_v55  ;;  %v55_v1 = vrot.slane %v54_v56, 1  ;;  %v62_v6 = vmax.f32 %v60_v51, %v61_v59  ;;  %v44_v8 = vmax.f32 %v42_v52, %v43_v60 }
  0x12   :  { %520 = vpow2.f32 %v357_v4  ;;  %v359_v5 = vmul.f32 1.442695, %v681_v3  ;;  %vm119_vm0 = vcmask 64512   ;;  %vm443_vm1 = vcmask 1040384  }
  0x13   :  { %v64_v10 = vsub.f32 %v661_v15, %v50_v63  ;;  %v56_v11 = vmax.f32 %v54_v56, %v55_v1  ;;  %v66_v2 = vsub.f32 %v663_v19, %v62_v6  ;;  %v63_v13 = vsub.f32 %v665_v20, %v44_v8 }
  0x14   :  { %522 = vpow2.f32 %v355_v9 }
  0x15   :  { %v69_v12 = vmul.f32 1.442695, %v64_v10  ;;  %v65_v14 = vsub.f32 %v37_v24, %v56_v11  ;;  %524 = vpow2.f32 %v359_v5  ;;  %v73_v16 = vmul.f32 1.442695, %v66_v2 }
  0x16   :  { %v67_v17 = vmul.f32 1.442695, %v63_v13  ;;  %526 = vpow2.f32 %v361_v0 }
  0x17   :  { %528 = vpow2.f32 %v69_v12  ;;  %v71_v18 = vmul.f32 1.442695, %v65_v14 }
  0x18   :  { %530 = vpow2.f32 %v73_v16 }
  0x19   :  { %532 = vpow2.f32 %v67_v17 }
  0x1a   :  { %534 = vpow2.f32 %v71_v18 }
  0x1c   :  { %v521_v15 = vpop.eup %520 }
  0x1d   :  { %v369_v22 = vrot.slane %v521_v15, 4  ;;  %v404_v23 = vmul.f32 %v521_v15, %v674_v58 }
  0x1e   :  { %v523_v21 = vpop.eup %522 }
  0x1f   :  { %v525_v19 = vpop.eup %524  ;;  %v363_v25 = vrot.slane %v523_v21, 4  ;;  %v403_v20 = vmul.f32 %v523_v21, %v676_v61  ;;  %v370_v24 = vadd.f32 %v521_v15, %v369_v22  ;;  %v413_v29 = vrot.slane %v404_v23, 4 }
  0x20   :  { %v527_v26 = vpop.eup %526  ;;  %v375_v27 = vrot.slane %v525_v19, 4  ;;  %v693_v28 = vmul.f32 %v525_v19, %v681_v3 }
  0x21   :  { %v695_v30 = vpop.eup %528  ;;  %v364_v31 = vadd.f32 %v523_v21, %v363_v25  ;;  %v381_v32 = vrot.slane %v527_v26, 4  ;;  %v698_v33 = vmul.f32 %v527_v26, %v679_v62  ;;  %v407_v34 = vrot.slane %v403_v20, 4 }
  0x22   :  { %v700_v35 = vpop.eup %530  ;;  %v81_v36 = vrot.slane %v695_v30, 4  ;;  %v371_v37 = vrot.slane %v370_v24, 2  ;;  %v376_v38 = vadd.f32 %v525_v19, %v375_v27  ;;  %v414_v39 = vadd.f32 %v413_v29, %v404_v23 }
  0x23   :  { %v703_v40 = vpop.eup %532  ;;  %v93_v41 = vrot.slane %v700_v35, 4  ;;  %v365_v42 = vrot.slane %v364_v31, 2  ;;  %v382_v43 = vadd.f32 %v527_v26, %v381_v32  ;;  %v408_v44 = vadd.f32 %v407_v34, %v403_v20 }
  0x24   :  { %v706_v45 = vpop.eup %534  ;;  %v82_v46 = vadd.f32 %v695_v30, %v81_v36  ;;  %v75_v47 = vrot.slane %v703_v40, 4  ;;  %v372_v48 = vadd.f32 %v371_v37, %v370_v24  ;;  %v377_v49 = vrot.slane %v376_v38, 2 }
  0x25   :  { %v94_v50 = vadd.f32 %v700_v35, %v93_v41  ;;  %v87_v51 = vrot.slane %v706_v45, 4  ;;  %v366_v52 = vadd.f32 %v365_v42, %v364_v31  ;;  %v383_v53 = vrot.slane %v382_v43, 2 }
  0x26   :  { %v83_v54 = vrot.slane %v82_v46, 2  ;;  %v76_v55 = vadd.f32 %v703_v40, %v75_v47  ;;  %v373_v56 = vrot.slane %v372_v48, 1  ;;  %v378_v57 = vadd.f32 %v377_v49, %v376_v38 }
  0x27   :  { %v95_v59 = vrot.slane %v94_v50, 2  ;;  %v88_v60 = vadd.f32 %v706_v45, %v87_v51  ;;  %v367_v63 = vrot.slane %v366_v52, 1  ;;  %v384_v1 = vadd.f32 %v383_v53, %v382_v43 }
  0x28   :  { %v84_v4 = vadd.f32 %v83_v54, %v82_v46  ;;  %v77_v6 = vrot.slane %v76_v55, 2  ;;  %v374_v8 = vadd.f32 %v373_v56, %v372_v48  ;;  %v379_v9 = vrot.slane %v378_v57, 1 }
  0x29   :  { %v96_v0 = vadd.f32 %v95_v59, %v94_v50  ;;  %v89_v10 = vrot.slane %v88_v60, 2  ;;  %v368_v11 = vadd.f32 %v367_v63, %v366_v52  ;;  %v385_v5 = vrot.slane %v384_v1, 1 }
  0x2a   :  { %v85_v2 = vrot.slane %v84_v4, 1  ;;  %v78_v13 = vadd.f32 %v77_v6, %v76_v55  ;;  %v380_v12 = vadd.f32 %v379_v9, %v378_v57  ;;  %536 = vlog2.f32 %v374_v8 }
  0x2b   :  { %v97_v14 = vrot.slane %v96_v0, 1  ;;  %v90_v16 = vadd.f32 %v89_v10, %v88_v60  ;;  %v386_v17 = vadd.f32 %v385_v5, %v384_v1  ;;  %538 = vlog2.f32 %v368_v11 }
  0x2c   :  { %v86_v18 = vadd.f32 %v85_v2, %v84_v4  ;;  %v79_v15 = vrot.slane %v78_v13, 1  ;;  %540 = vlog2.f32 %v380_v12  ;;  %v409_v23 = vrot.slane %v408_v44, 2 }
  0x2d   :  { %v98_v21 = vadd.f32 %v97_v14, %v96_v0  ;;  %v91_v22 = vrot.slane %v90_v16, 1  ;;  %542 = vlog2.f32 %v386_v17  ;;  %v415_v25 = vrot.slane %v414_v39, 2 }
  0x2e   :  { %544 = vrcp.f32 %v86_v18  ;;  %v80_v19 = vadd.f32 %v79_v15, %v78_v13  ;;  %v419_v20 = vrot.slane %v693_v28, 4  ;;  %v425_v24 = vrot.slane %v698_v33, 4 }
  0x2f   :  { %546 = vrcp.f32 %v98_v21  ;;  %v92_v26 = vadd.f32 %v91_v22, %v90_v16  ;;  %v410_v29 = vadd.f32 %v409_v23, %v408_v44  ;;  %v416_v32 = vadd.f32 %v415_v25, %v414_v39  ;;  %v30_v23 = vld [vmem:[%s830_s2 + $0x18] sm:$0xff] }
  0x30   :  { %548 = vrcp.f32 %v80_v19  ;;  %v420_v27 = vadd.f32 %v419_v20, %v693_v28  ;;  %v426_v31 = vadd.f32 %v425_v24, %v698_v33 }
  0x31   :  { %550 = vrcp.f32 %v92_v26  ;;  %v411_v43 = vrot.slane %v410_v29, 1  ;;  %v417_v28 = vrot.slane %v416_v32, 1 }
  0x32   :  { %v421_v34 = vrot.slane %v420_v27, 2  ;;  %552 = vrcp.f32 %v368_v11  ;;  %v427_v36 = vrot.slane %v426_v31, 2 }
  0x33   :  { %554 = vrcp.f32 %v374_v8  ;;  %v412_v57 = vadd.f32 %v411_v43, %v410_v29 }
  0x34   :  { %v537_v37 = vpop.eup %536  ;;  %v422_v38 = vadd.f32 %v421_v34, %v420_v27  ;;  %556 = vrcp.f32 %v380_v12  ;;  %v428_v46 = vadd.f32 %v427_v36, %v426_v31 }
  0x35   :  { %v539_v41 = vpop.eup %538  ;;  %v390_v42 = vmul.f32 0.6931472, %v537_v37  ;;  %558 = vrcp.f32 %v386_v17  ;;  %v29_v17 = vld [vmem:[%s830_s2 + $0x10] sm:$0xff] }
  0x36   :  { %v541_v47 = vpop.eup %540  ;;  %v388_v48 = vmul.f32 0.6931472, %v539_v41  ;;  %v423_v39 = vrot.slane %v422_v38, 1  ;;  %v429_v53 = vrot.slane %v428_v46, 1 }
  0x37   :  { %v543_v49 = vpop.eup %542  ;;  %v392_v44 = vmul.f32 0.6931472, %v541_v47  ;;  %v396_v33 = vsub.f32 %v674_v58, %v390_v42  ;;  %v418_v58 = vadd.f32 %v417_v28, %v416_v32 }
  0x38   :  { %v545_v50 = vpop.eup %544  ;;  %v394_v51 = vmul.f32 0.6931472, %v543_v49  ;;  %v395_v52 = vsub.f32 %v676_v61, %v388_v48  ;;  %v27_v61 = vld [vmem:[%s830_s2] sm:$0xff] }
  0x39   :  { %v547_v54 = vpop.eup %546  ;;  %v108_v55 = vmul.f32 %v545_v50, %v695_v30  ;;  %v397_v56 = vsub.f32 %v681_v3, %v392_v44  ;;  %400 = vst [vmem:[#allocation3 + $0x8] sm:$0xff] %v396_v33  ;;  %v424_v3 = vadd.f32 %v423_v39, %v422_v38 }
  0x3a   :  { %v549_v59 = vpop.eup %548  ;;  %v110_v60 = vmul.f32 %v547_v54, %v700_v35  ;;  %v398_v63 = vsub.f32 %v679_v62, %v394_v51  ;;  %399 = vst [vmem:[#allocation3] sm:$0xff] %v395_v52  ;;  %v430_v35 = vadd.f32 %v429_v53, %v428_v46 }
  0x3b   :  { %v551_v1 = vpop.eup %550  ;;  %132 = vmatprep.subr.mxu0 %v108_v55  ;;  %v107_v4 = vmul.f32 %v549_v59, %v703_v40  ;;  %401 = vst [vmem:[#allocation3 + $0x10] sm:$0xff] %v397_v56 }
  0x3c   :  { %v553_v30 = vpop.eup %552  ;;  %221 = vmatprep.subr.mxu1 %v110_v60  ;;  %v109_v6 = vmul.f32 %v551_v1, %v706_v45  ;;  %402 = vst [vmem:[#allocation3 + $0x18] sm:$0xff] %v398_v63  ;;  %v28_v45 = vld [vmem:[%s830_s2 + $0x8] sm:$0xff] }
  0x3d   :  { %v555_v62 = vpop.eup %554  ;;  %133 = vmatpush1.msra.mxu0 %v107_v4  ;;  %v432_v8 = vmul.f32 %v553_v30, %v412_v57 }
  0x3e   :  { %v557_v9 = vpop.eup %556  ;;  %222 = vmatpush1.msra.mxu1 %v109_v6  ;;  %496 = vmatmul.mubr.msk.f32.vlgmr.msra.gmra.mrb[0].mxu0 %vm119_vm0, %v27_v61  ;;  %v434_v40 = vmul.f32 %v555_v62, %v418_v58 }
  0x3f   :  { %v559_v0 = vpop.eup %558  ;;  %500 = vmatmul.mubr.msk.f32.vlgmr.msra.gmra.mrb[0].mxu1 %vm119_vm0, %v27_v61  ;;  %202 = vmatprep.mubr.f32.mxu0 %v596_v7  ;;  %v436_v10 = vmul.f32 %v557_v9, %v424_v3  ;;  %v439_v11 = vsub.f32 %v432_v8, %v388_v48 }
  0x40   :  { %291 = vmatprep.mubr.f32.mxu1 %v596_v7  ;;  %v438_v5 = vmul.f32 %v559_v0, %v430_v35  ;;  %v440_v2 = vsub.f32 %v434_v40, %v390_v42 }
  0x41   :  { %v441_v13 = vsub.f32 %v436_v10, %v392_v44  ;;  %v444_v12 = vsel %vm443_vm1, %v439_v11, 0.0 }
  0x42   :  { %497 = vmatmul.mubr.msk.f32.gmra.mrb[2].mxu0 %vm119_vm0, %v28_v45  ;;  %v442_v14 = vsub.f32 %v438_v5, %v394_v51  ;;  %v445_v16 = vsel %vm443_vm1, %v440_v2, 0.0 }
  0x43   :  { %501 = vmatmul.mubr.msk.f32.gmra.mrb[2].mxu1 %vm119_vm0, %v28_v45  ;;  %208 = vmatprep.mubr.f32.mxu0 %v596_v7  ;;  %v446_v18 = vadd.f32 %v445_v16, %v444_v12  ;;  %v447_v15 = vsel %vm443_vm1, %v441_v13, 0.0 }
  0x44   :  { %297 = vmatprep.mubr.f32.mxu1 %v596_v7  ;;  %v449_v21 = vsel %vm443_vm1, %v442_v14, 0.0 }
  0x45   :  { %v448_v22 = vadd.f32 %v447_v15, %v446_v18 }
  0x46   :  { %498 = vmatmul.mubr.msk.f32.gmra.mrb[4].mxu0 %vm119_vm0, %v29_v17 }
  0x47   :  { %502 = vmatmul.mubr.msk.f32.gmra.mrb[4].mxu1 %vm119_vm0, %v29_v17  ;;  %214 = vmatprep.mubr.f32.mxu0 %v596_v7  ;;  %v450_v19 = vadd.f32 %v449_v21, %v448_v22 }
  0x48   :  { %303 = vmatprep.mubr.f32.mxu1 %v596_v7 }
  0x49   :  { %451 = vadd.xlane.f32.xlu0 %v450_v19 }
  0x4a   :  { %499 = vmatmul.mubr.msk.f32.gmra.mrb[6].mxu0 %vm119_vm0, %v30_v23 }
  0x4b   :  { %503 = vmatmul.mubr.msk.f32.gmra.mrb[6].mxu1 %vm119_vm0, %v30_v23 }
  0x4c   :  { %571 = shalt.err (!%p568_p4)
}
  0x4d   :  { %s572_s19 = scalar_lea.hbm %s832_s4, 512 }
  0x4e   :  { %p573_p5 = scmp.ne.s32.totalorder %s832_s4, %s572_s19  ;;  %p576_p6 = scmp.lt.u32.totalorder %s572_s19, %s832_s4 }
  0x50   :  { %p578_p7 = pnand %p576_p6, %p573_p5 }
  0x52   :  { %581 = shalt.err (!%p578_p7)
}
  0x53   :  { %s598_s24 = smov 256   ;;  %s599_s25 = smov 16  }
  0x54   :  { %476 = dma.vmem_to_hbm [thread:$0]  %s471_s16, 512, %s832_s4, [#allocation4], %s598_s24, %s598_s24, %s599_s25  }
  0x55   :  { %s582_s19 = scalar_lea.hbm %s833_s5, 16 }
  0x56   :  { %p583_p8 = scmp.ne.s32.totalorder %s833_s5, %s582_s19  ;;  %p586_p9 = scmp.lt.u32.totalorder %s582_s19, %s833_s5 }
  0x58   :  { %p588_p10 = pnand %p586_p9, %p583_p8 }
  0xd6   :  { %v452_v7 = vpop.xlane.xlu0 %451 }
  0xd7   :  { %v453_v25 = vrot.slane %v452_v7, 4 }
  0xd9   :  { %v454_v20 = vadd.f32 %v453_v25, %v452_v7 }
  0xdb   :  { %v455_v26 = vrot.slane %v454_v20, 2 }
  0xdd   :  { %v456_v24 = vadd.f32 %v455_v26, %v454_v20 }
  0xdf   :  { %v457_v27 = vrot.slane %v456_v24, 1 }
  0xe1   :  { %v458_v29 = vadd.f32 %v457_v27, %v456_v24 }
  0xe3   :  { %513 = vpush %v458_v29 }
 0x111   :  { %v198_v31 = vpop.f32.mrb[0].mxu0 }
 0x112   :  { %310 = vst [vmem:[%s831_s3] sm:$0xff] %v198_v31  ;;  %v287_v32 = vpop.f32.mrb[0].mxu1  ;;  %v200_v34 = vpop.f32.mrb[1].mxu0 }
 0x113   :  { %504 = vst [vmem:[%s831_s3 + $0x40] sm:$0xff] %v287_v32  ;;  %311 = vst [vmem:[%s831_s3 + $0x8] sm:$0xff] %v200_v34  ;;  %v289_v36 = vpop.f32.mrb[1].mxu1 }
 0x114   :  { %505 = vst [vmem:[%s831_s3 + $0x48] sm:$0xff] %v289_v36  ;;  %s514_s1 = spop %513 }
 0x115   :  { %v204_v37 = vpop.f32.mrb[2].mxu0  ;;  %s512_s9 = sadd.f32 1064.6741, %s514_s1 }
 0x116   :  { %312 = vst [vmem:[%s831_s3 + $0x10] sm:$0xff] %v204_v37  ;;  %v293_v38 = vpop.f32.mrb[2].mxu1  ;;  %v206_v41 = vpop.f32.mrb[3].mxu0 }
 0x117   :  { %506 = vst [vmem:[%s831_s3 + $0x50] sm:$0xff] %v293_v38  ;;  %462 = sst [smem:[#allocation6]] %s512_s9  ;;  %313 = vst [vmem:[%s831_s3 + $0x18] sm:$0xff] %v206_v41  ;;  %v295_v42 = vpop.f32.mrb[3].mxu1 }
 0x118   :  { %507 = vst [vmem:[%s831_s3 + $0x58] sm:$0xff] %v295_v42 }
 0x119   :  { %591 = shalt.err (!%p588_p10)
}
 0x11a   :  { %s600_s24 = smov [#allocation6]   ;;  %v210_v43 = vpop.f32.mrb[4].mxu0  ;;  %v299_v46 = vpop.f32.mrb[4].mxu1 }
 0x11b   :  { %484 = dma.smem_to_hbm %s600_s24, 16, %s833_s5, [#allocation5]   ;;  %314 = vst [vmem:[%s831_s3 + $0x20] sm:$0xff] %v210_v43  ;;  %v212_v47 = vpop.f32.mrb[5].mxu0  ;;  %508 = vst [vmem:[%s831_s3 + $0x60] sm:$0xff] %v299_v46  ;;  %v301_v48 = vpop.f32.mrb[5].mxu1 }
 0x11c   :  { %315 = vst [vmem:[%s831_s3 + $0x28] sm:$0xff] %v212_v47  ;;  %509 = vst [vmem:[%s831_s3 + $0x68] sm:$0xff] %v301_v48 }
 0x11d   :  { %v216_v28 = vpop.f32.mrb[6].mxu0 }
 0x11e   :  { %316 = vst [vmem:[%s831_s3 + $0x30] sm:$0xff] %v216_v28  ;;  %v305_v49 = vpop.f32.mrb[6].mxu1  ;;  %v218_v44 = vpop.f32.mrb[7].mxu0 }
 0x11f   :  { %510 = vst [vmem:[%s831_s3 + $0x70] sm:$0xff] %v305_v49  ;;  %317 = vst [vmem:[%s831_s3 + $0x38] sm:$0xff] %v218_v44  ;;  %v307_v33 = vpop.f32.mrb[7].mxu1 }
 0x120   :  { %511 = vst [vmem:[%s831_s3 + $0x78] sm:$0xff] %v307_v33 }
 0x121   :  { %592 = dma.done.wait [#allocation4], 512  }
 0x122   :  { %593 = vsyncadd [#allocation4], 4294966784 }
 0x123   :  { %594 = dma.done.wait [#allocation5], 16  }
 0x124   :  { %595 = vsyncadd [#allocation5], 4294967280 }
 0x125   :  { %493 = sfence }
 0x126   :  { %494 = vsyncpa [#allocation4], 1 }
 0x127   :  { %495 = vsyncpa [#allocation5], 1 }

</bundles_post_ra>
